<compile_context>
chip_gen: v6e
topology: v6e:2x2x1
jax: 0.10.0
libtpu: 0.0.40
codegen_flags: <defaults>
</compile_context>

<pallas_src>
import functools
import numpy as np
import jax
import jax.numpy as jnp
from jax import lax
from jax.experimental import pallas as pl
from jax.experimental.pallas import tpu as pltpu

EPS = 1e-8
BN_EPS = 1e-5
PACK_LANES = 128  # lane-dense packed output width for the pooling kernel


def _pick_batch_block(bsz, max_block=4):
    """Largest divisor of bsz (<= max_block) that still leaves >= 2 grid steps.

    Fatter steps amortize the ~0.35us per-grid-step overhead (the grid is a
    serial loop on v5e/v6e); >= 2 steps keeps both v7x TensorCores busy.
    """
    for cand in range(min(bsz, max_block), 0, -1):
        if bsz % cand == 0 and bsz // cand >= 2:
            return cand
    return bsz


# ----------------------------------------------------------------------------
# Kernel 1: per-graph GIN aggregation + Linear, with masked BN partial stats
#   (block-per-graph; never materializes the (B*N)^2 block-diagonal matrix)
# ----------------------------------------------------------------------------
def _gin_agg_linear_kernel(adj_ref, x_ref, mask_ref, w_ref, b_ref,
                           y_ref, s1_ref, s2_ref, *, gin_eps, bblk):
    f32 = jnp.float32
    bf16 = jnp.bfloat16
    w_bf = w_ref[...].astype(bf16)
    bias = b_ref[...]
    for bb in range(bblk):
        adj_bf = adj_ref[bb]                       # [N,N] bf16, A[src,dst] + I
        x = x_ref[bb]                              # [N,F] f32
        mask = mask_ref[bb]                        # [N,1] f32
        # GIN aggregation over in-neighbours: (A^T + (1+eps) I) x
        # contract the src axis of adj (same array reused by the pool kernel).
        agg = lax.dot_general(adj_bf, x.astype(bf16), (((0,), (0,)), ((), ())),
                              preferred_element_type=f32)
        if gin_eps != 0.0:
            agg = agg + gin_eps * x
        y = jnp.dot(agg.astype(bf16), w_bf, preferred_element_type=f32) + bias
        y_ref[bb] = y
        ym = y * mask                              # exclude padded rows from BN stats
        s1_ref[bb] = jnp.sum(ym, axis=0, keepdims=True)
        s2_ref[bb] = jnp.sum(ym * ym, axis=0, keepdims=True)


def gin_agg_linear(adj_hat_bf, x_batch, mask, w, b, gin_eps):
    bsz, n, f = x_batch.shape
    bblk = _pick_batch_block(bsz)
    kern = functools.partial(_gin_agg_linear_kernel,
                             gin_eps=float(gin_eps), bblk=bblk)
    return pl.pallas_call(
        kern,
        out_shape=(jax.ShapeDtypeStruct((bsz, n, f), jnp.float32),
                   jax.ShapeDtypeStruct((bsz, 1, f), jnp.float32),
                   jax.ShapeDtypeStruct((bsz, 1, f), jnp.float32)),
        grid=(bsz // bblk,),
        in_specs=[
            pl.BlockSpec((bblk, n, n), lambda i: (i, 0, 0)),
            pl.BlockSpec((bblk, n, f), lambda i: (i, 0, 0)),
            pl.BlockSpec((bblk, n, 1), lambda i: (i, 0, 0)),
            pl.BlockSpec((f, f), lambda i: (0, 0)),
            pl.BlockSpec((1, f), lambda i: (0, 0)),
        ],
        out_specs=(
            pl.BlockSpec((bblk, n, f), lambda i: (i, 0, 0)),
            pl.BlockSpec((bblk, 1, f), lambda i: (i, 0, 0)),
            pl.BlockSpec((bblk, 1, f), lambda i: (i, 0, 0)),
        ),
        compiler_params=pltpu.CompilerParams(dimension_semantics=("parallel",)),
    )(adj_hat_bf, x_batch, mask, w, b.reshape(1, f))


# ----------------------------------------------------------------------------
# Kernel 2: fused per-batch-block LaPool pipeline
#   BN(train)+ReLU of the GIN output, leader scores, in-kernel top-k selection,
#   cosine attention, hop-path prior, sparsegen, S^T A S and S^T h.
#   Output: one lane-dense [K, 128] slab per graph = [new_adj | pooled | pad].
# ----------------------------------------------------------------------------
def _lapool_pool_kernel(adj_ref, y_ref, mask_ref, scale_ref, shift_ref, out_ref,
                        *, cluster_num, hop, sigma, bblk):
    f32 = jnp.float32
    bf16 = jnp.bfloat16
    k = cluster_num
    n = adj_ref.shape[-1]
    fdim = y_ref.shape[-1]

    bn_scale = scale_ref[...]                                           # [1,F]
    bn_shift = shift_ref[...]                                           # [1,F]

    # per-call constants, hoisted out of the per-graph loop
    iota_col = lax.broadcasted_iota(jnp.int32, (n, 1), 0).astype(f32)   # [N,1]
    iota_row_k = lax.broadcasted_iota(jnp.int32, (1, k), 1)             # [1,K]
    ones_col = jnp.ones((n, 1), dtype=bf16)
    krow = lax.broadcasted_iota(jnp.int32, (k, k), 0)
    kcol = lax.broadcasted_iota(jnp.int32, (k, k), 1)
    off_diag_k = (krow != kcol).astype(f32)                             # [K,K]
    # exact 0/1 placement matrices for the lane-dense packed store
    lane_a = lax.broadcasted_iota(jnp.int32, (k, PACK_LANES), 1)
    row_a = lax.broadcasted_iota(jnp.int32, (k, PACK_LANES), 0)
    pack_adj = (lane_a == row_a).astype(f32)                            # [K,128]
    lane_p = lax.broadcasted_iota(jnp.int32, (fdim, PACK_LANES), 1)
    row_p = lax.broadcasted_iota(jnp.int32, (fdim, PACK_LANES), 0)
    pack_pool = (lane_p == row_p + k).astype(f32)                       # [F,128]

    inv_one_minus_sigma = 1.0 / (1.0 - sigma)

    for bb in range(bblk):
        adj_bf = adj_ref[bb]                                            # [N,N] bf16 (A + I)
        mask = mask_ref[bb]                                             # [N,1] f32

        # --- h = ReLU(BN(Linear(agg))) fused here; padded rows zeroed --------
        h = jnp.maximum(y_ref[bb] * bn_scale + bn_shift, 0.0) * mask    # [N,F]
        h_bf = h.astype(bf16)

        # --- Laplacian action without materializing L (reg_mode=0) -----------
        deg = jnp.dot(adj_bf, ones_col, preferred_element_type=f32)     # [N,1]
        lap = deg * h - jnp.dot(adj_bf, h_bf, preferred_element_type=f32)
        lap_norm = jnp.sqrt(jnp.sum(lap * lap, axis=-1, keepdims=True))  # [N,1]

        # --- neighbour-mean Laplacian-norm difference scores ------------------
        # NOTE: assumes edge_index has no self-loops / duplicate edges, so
        # adj_hat has an exact unit diagonal: A_noDiag@v == A_hat@v - v and
        # its row degree == deg - 1 (true for to_dense_adj-style inputs).
        node_deg = deg - 1.0
        inv_deg = jnp.where(node_deg > 0.5,
                            1.0 / jnp.maximum(node_deg, 1.0), 0.0)
        nei_sum = jnp.dot(adj_bf, lap_norm.astype(bf16),
                          preferred_element_type=f32) - lap_norm        # [N,1]
        nei_diff = lap_norm - inv_deg * nei_sum
        min_val = jnp.min(nei_diff, axis=0, keepdims=True)              # [1,1]
        scores = (nei_diff - min_val + jnp.abs(min_val)) * mask         # [N,1]

        # --- leader selection: iterative top-k, builds one-hot selector P ----
        # TODO(synk): tie order is lowest-index-wins, may differ from torch.topk.
        p_sel = jnp.zeros((n, k), dtype=f32)
        s_work = scores
        for j in range(k):
            m = jnp.max(s_work, axis=0, keepdims=True)                  # [1,1]
            cand = jnp.where(s_work == m, iota_col, jnp.float32(n))
            pos = jnp.min(cand, axis=0, keepdims=True)                  # [1,1]
            onehot = (iota_col == pos).astype(f32)                      # [N,1]
            p_sel = p_sel + onehot * (iota_row_k == j).astype(f32)      # [N,K]
            s_work = jnp.where(onehot > 0.0, jnp.float32(-1e30), s_work)
        p_bf = p_sel.astype(bf16)

        # --- clusters = h[leaders]; cosine attention (per-norm EPS clamp) ----
        clusters = lax.dot_general(p_bf, h_bf, (((0,), (0,)), ((), ())),
                                   preferred_element_type=f32)          # [K,F]
        h_inv = lax.rsqrt(jnp.maximum(
            jnp.sum(h * h, axis=-1, keepdims=True), EPS * EPS))         # EUP
        c_inv = lax.rsqrt(jnp.maximum(
            jnp.sum(clusters * clusters, axis=-1, keepdims=True), EPS * EPS))
        attn = lax.dot_general((h * h_inv).astype(bf16),
                               (clusters * c_inv).astype(bf16),
                               (((1,), (1,)), ((), ())),
                               preferred_element_type=f32)              # [N,K]

        # --- path-length prior, propagated through the one-hot selector ------
        # G @ P is a column select of G and clamp commutes with it, so only
        # [N,K] intermediates are needed (never dense N x N adjacency powers).
        # TODO(synk): hop=-1 scipy shortest-path branch not implemented (host algo).
        t = jnp.dot(adj_bf, p_bf, preferred_element_type=f32)           # [N,K]
        if hop >= 2:
            g_sel = jnp.minimum(t, 1.0)
            for _ in range(2, hop + 1):
                t = jnp.dot(adj_bf, t.astype(bf16), preferred_element_type=f32)
                g_sel = g_sel + jnp.minimum(t, 1.0)
        else:
            g_sel = t
        z = attn * (g_sel + EPS) * inv_one_minus_sigma

        # --- sparsegen = sparsemax(z / (1 - sigma)): sort-free support rule --
        k_cnt = jnp.zeros_like(z)
        s_cum = jnp.zeros_like(z)
        for i in range(k):
            zi = z[:, i:i + 1]                                          # [N,1]
            ge = (zi >= z).astype(f32)                                  # [N,K]
            k_cnt = k_cnt + ge
            s_cum = s_cum + zi * ge
        supp = (1.0 + k_cnt * z > s_cum).astype(f32)                    # [N,K]
        kz = jnp.maximum(jnp.sum(supp, axis=-1, keepdims=True), 1.0)
        tau = (jnp.sum(z * supp, axis=-1, keepdims=True) - 1.0) / kz
        s_mat = jnp.maximum(z - tau, 0.0)                               # [N,K]
        s_bf = s_mat.astype(bf16)

        # --- pooled adjacency S^T A S (no diag) and pooled features S^T h ----
        st_adj = lax.dot_general(s_bf, adj_bf, (((0,), (0,)), ((), ())),
                                 preferred_element_type=f32)            # [K,N]
        new_adj = jnp.dot(st_adj.astype(bf16), s_bf,
                          preferred_element_type=f32) * off_diag_k      # [K,K]
        pooled = lax.dot_general(s_bf, h_bf, (((0,), (0,)), ((), ())),
                                 preferred_element_type=f32)            # [K,F]

        # single lane-dense [K,128] store per graph (placement matmuls are exact)
        out_ref[bb] = (jnp.dot(new_adj, pack_adj, preferred_element_type=f32)
                       + jnp.dot(pooled, pack_pool, preferred_element_type=f32))


def lapool_pool(adj_hat_bf, y_lin, mask, bn_scale, bn_shift, *,
                cluster_num, hop, sigma):
    bsz, n, f = y_lin.shape
    assert cluster_num + f <= PACK_LANES, "packed output exceeds 128 lanes"
    bblk = _pick_batch_block(bsz)
    kern = functools.partial(_lapool_pool_kernel, cluster_num=int(cluster_num),
                             hop=int(hop), sigma=float(sigma), bblk=bblk)
    packed = pl.pallas_call(
        kern,
        out_shape=jax.ShapeDtypeStruct((bsz, cluster_num, PACK_LANES),
                                       jnp.float32),
        grid=(bsz // bblk,),
        in_specs=[
            pl.BlockSpec((bblk, n, n), lambda i: (i, 0, 0)),
            pl.BlockSpec((bblk, n, f), lambda i: (i, 0, 0)),
            pl.BlockSpec((bblk, n, 1), lambda i: (i, 0, 0)),
            pl.BlockSpec((1, f), lambda i: (0, 0)),
            pl.BlockSpec((1, f), lambda i: (0, 0)),
        ],
        out_specs=pl.BlockSpec((bblk, cluster_num, PACK_LANES),
                               lambda i: (i, 0, 0)),
        compiler_params=pltpu.CompilerParams(
            dimension_semantics=("parallel",),
            # explicit budget with headroom for larger max_nodes on v7x (64 MiB)
            vmem_limit_bytes=48 * 1024 * 1024),
    )(adj_hat_bf, y_lin, mask, bn_scale.reshape(1, f), bn_shift.reshape(1, f))
    new_adj = packed[:, :, :cluster_num]
    pooled = packed[:, :, cluster_num:cluster_num + f]
    return new_adj, pooled


# ----------------------------------------------------------------------------
# Kernel 3: fused GINConv aggregation + Linear + BatchNorm1d(train) + ReLU,
#   used for the (small, data-dependent) pooled graph of the second GIN layer.
# ----------------------------------------------------------------------------
def _gin_mlp_kernel(a_ref, x_ref, w_ref, b_ref, g_ref, bt_ref, o_ref):
    f32 = jnp.float32
    bf16 = jnp.bfloat16
    # a_ref already holds A + (1 + eps) * I, so the GIN update is one matmul.
    y = jnp.dot(a_ref[...].astype(bf16), x_ref[...].astype(bf16),
                preferred_element_type=f32)
    y = jnp.dot(y.astype(bf16), w_ref[...].astype(bf16),
                preferred_element_type=f32) + b_ref[...]
    n = y.shape[0]
    s1 = jnp.sum(y, axis=0, keepdims=True)
    s2 = jnp.sum(y * y, axis=0, keepdims=True)
    mean = s1 * (1.0 / n)
    var = jnp.maximum(s2 * (1.0 / n) - mean * mean, 0.0)
    y = (y - mean) * lax.rsqrt(var + BN_EPS) * g_ref[...] + bt_ref[...]
    o_ref[...] = jnp.maximum(y, 0.0)


def gin_mlp(a, x, w, b, gamma, beta, gin_eps=0.0):
    n, f = x.shape
    a_hat = a + (1.0 + float(gin_eps)) * jnp.eye(n, dtype=jnp.float32)
    return pl.pallas_call(
        _gin_mlp_kernel,
        out_shape=jax.ShapeDtypeStruct((n, f), jnp.float32),
        grid=(1,),
        in_specs=[
            pl.BlockSpec((n, n), lambda i: (0, 0)),
            pl.BlockSpec((n, f), lambda i: (0, 0)),
            pl.BlockSpec((f, f), lambda i: (0, 0)),
            pl.BlockSpec((1, f), lambda i: (0, 0)),
            pl.BlockSpec((1, f), lambda i: (0, 0)),
            pl.BlockSpec((1, f), lambda i: (0, 0)),
        ],
        out_specs=pl.BlockSpec((n, f), lambda i: (0, 0)),
        compiler_params=pltpu.CompilerParams(dimension_semantics=("arbitrary",)),
    )(a_hat, x, w, b.reshape(1, f), gamma.reshape(1, f), beta.reshape(1, f))


# ----------------------------------------------------------------------------
# Host / plain-JAX glue
# ----------------------------------------------------------------------------
def make_params(key, f):
    k1, k2, k3, k4 = jax.random.split(key, 4)
    scale = 1.0 / np.sqrt(f)
    return dict(
        w1=jax.random.uniform(k1, (f, f), jnp.float32, -scale, scale),
        b1=jax.random.uniform(k2, (f,), jnp.float32, -scale, scale),
        g1=jnp.ones((f,), jnp.float32), beta1=jnp.zeros((f,), jnp.float32),
        w2=jax.random.uniform(k3, (f, f), jnp.float32, -scale, scale),
        b2=jax.random.uniform(k4, (f,), jnp.float32, -scale, scale),
        g2=jnp.ones((f,), jnp.float32), beta2=jnp.zeros((f,), jnp.float32),
        eps1=0.0, eps2=0.0,
    )


def lapool_forward(x, edge_index, ptr, params, cluster_num=4, hop=2, sigma=0.8):
    x = jnp.asarray(x, jnp.float32)
    edge_index = np.asarray(edge_index, np.int64)
    ptr = np.asarray(ptr, np.int64)
    n_total, f = x.shape
    bsz = len(ptr) - 1
    sizes = ptr[1:] - ptr[:-1]
    max_nodes = int(sizes.max())
    src, dst = edge_index[0], edge_index[1]

    # --- dense per-graph adjacency (I + to_dense_adj) by device scatter; kept
    #     block-per-graph (never the (B*N)^2 flat matrix), cast to bf16 (exact
    #     small-int entries) for MXU operands / halved DMA bytes.
    node_batch = np.zeros((n_total,), np.int64)
    for p in range(bsz):
        node_batch[ptr[p]:ptr[p + 1]] = p
    bidx = node_batch[src]
    a_dense = jnp.zeros((bsz, max_nodes, max_nodes), jnp.float32).at[
        jnp.asarray(bidx.astype(np.int32)),
        jnp.asarray((src - ptr[bidx]).astype(np.int32)),
        jnp.asarray((dst - ptr[bidx]).astype(np.int32))].add(1.0)
    adj_hat = a_dense + jnp.eye(max_nodes, dtype=jnp.float32)[None]
    adj_hat_bf = adj_hat.astype(jnp.bfloat16)

    # batched raw node features and node mask (device gather, no D2H)
    gather_idx = np.full((bsz, max_nodes), n_total, np.int32)  # -> zero row
    mask_np = np.zeros((bsz, max_nodes, 1), np.float32)
    for p in range(bsz):
        num = int(ptr[p + 1] - ptr[p])
        gather_idx[p, :num] = np.arange(ptr[p], ptr[p] + num, dtype=np.int32)
        mask_np[p, :num, 0] = 1.0
    x_pad = jnp.concatenate([x, jnp.zeros((1, f), jnp.float32)], axis=0)
    x_batch = jnp.take(x_pad, jnp.asarray(gather_idx), axis=0)  # [B, N, F]
    mask = jnp.asarray(mask_np)

    # --- h = self.net(x, edge_index): batched aggregation + Linear kernel,
    #     BN(train) statistics reduced over the real nodes (tiny XLA reduce);
    #     the BN normalize + ReLU is fused into the pooling kernel below.
    y_lin, s1, s2 = gin_agg_linear(adj_hat_bf, x_batch, mask,
                                   params['w1'], params['b1'], params['eps1'])
    n_real = float(n_total)
    mean = jnp.sum(s1, axis=0) / n_real                               # [1, F]
    var = jnp.maximum(jnp.sum(s2, axis=0) / n_real - mean * mean, 0.0)
    bn_scale = params['g1'].reshape(1, f) * lax.rsqrt(var + BN_EPS)
    bn_shift = params['beta1'].reshape(1, f) - mean * bn_scale

    # --- fused pooling pipeline: one pallas_call over batch blocks ------------
    new_adj, clusters_pool = lapool_pool(
        adj_hat_bf, y_lin, mask, bn_scale, bn_shift,
        cluster_num=cluster_num, hop=hop, sigma=sigma)

    # --- compute_adj: data-dependent edge extraction (single tiny [B,K,K] D2H
    #     read, mirrors the torch original's .cpu()/np.where) ------------------
    adj_np = np.asarray(new_adj)
    edge_inx = None
    max_node = 0
    new_prt = [0]
    for i in range(bsz):
        e = np.stack(np.nonzero(adj_np[i] != 0)).astype(np.int64)
        if edge_inx is None:
            # TODO(synk): empty pooled graph (no nonzeros) unhandled, as in the torch original.
            edge_inx = e
            max_node = int(edge_inx.max()) + 1
            new_prt.append(max_node)
        else:
            e = e + max_node
            if e.shape[1] > 1:
                max_node = int(e.max()) + 1
            edge_inx = np.concatenate([edge_inx, e], axis=1)
            new_prt.append(max_node)

    # --- compute_feats: slice device-resident pooled feats, run feat_update ---
    feats, new_batch = [], []
    for p in range(bsz):
        n_p = int(new_prt[p + 1] - new_prt[p])
        feats.append(clusters_pool[p, :n_p, :])
        new_batch.append(np.full((n_p,), p, np.int64))
    new_feat = jnp.concatenate(feats, axis=0)
    new_batch = jnp.asarray(np.concatenate(new_batch), jnp.int32)

    m_total = int(new_feat.shape[0])
    a_new = jnp.zeros((m_total, m_total), jnp.float32).at[
        jnp.asarray(edge_inx[1].astype(np.int32)),
        jnp.asarray(edge_inx[0].astype(np.int32))].add(1.0)
    new_feat = gin_mlp(a_new, new_feat, params['w2'], params['b2'],
                       params['g2'], params['beta2'], params['eps2'])

    return new_feat, jnp.asarray(edge_inx.astype(np.int32)), new_batch


if __name__ == "__main__":
    key = jax.random.PRNGKey(0)
    bsz, n_per, feat, k_clusters = 4, 16, 32, 4
    ptr = np.arange(0, (bsz + 1) * n_per, n_per, dtype=np.int64)

    # deterministic graphs: ring + chords, undirected (both directions stored)
    edges = []
    for g in range(bsz):
        off = g * n_per
        for i in range(n_per):
            j = (i + 1) % n_per
            edges.append((off + i, off + j))
            edges.append((off + j, off + i))
        for (i, j) in [(0, 5), (2, 9), (4, 13), (7, 11)]:
            edges.append((off + i, off + j))
            edges.append((off + j, off + i))
    edge_index = np.array(edges, np.int64).T                     # [2, 160]

    kx, kp = jax.random.split(key)
    x = jax.random.normal(kx, (bsz * n_per, feat), jnp.float32)
    params = make_params(kp, feat)

    new_feat, new_edge_index, new_batch = lapool_forward(
        x, edge_index, ptr, params, cluster_num=k_clusters, hop=2, sigma=0.8)
    jax.block_until_ready(new_feat)
    jax.block_until_ready(new_batch)
    print("KERNEL_OK")
</pallas_src>

<mosaic_0001>
module attributes {stable_mosaic.version = 11 : i64} {
  func.func @_gin_agg_linear_kernel(%arg0: i32, %arg1: memref<2x16x16xbf16, #tpu.memory_space<vmem>>, %arg2: memref<2x16x32xf32, #tpu.memory_space<vmem>>, %arg3: memref<2x16x1xf32, #tpu.memory_space<vmem>>, %arg4: memref<32x32xf32, #tpu.memory_space<vmem>>, %arg5: memref<1x32xf32, #tpu.memory_space<vmem>>, %arg6: memref<2x16x32xf32, #tpu.memory_space<vmem>>, %arg7: memref<2x1x32xf32, #tpu.memory_space<vmem>>, %arg8: memref<2x1x32xf32, #tpu.memory_space<vmem>>) attributes {dimension_semantics = [#tpu.dimension_semantics<parallel>], iteration_bounds = array<i64: 2>, scalar_prefetch = 0 : i64, scratch_operands = 0 : i64, tpu.core_type = #tpu.core_type<tc>, window_params = [{transform_indices = @transform_0, window_bounds = array<i64: 2, 16, 16>}, {transform_indices = @transform_1, window_bounds = array<i64: 2, 16, 32>}, {transform_indices = @transform_2, window_bounds = array<i64: 2, 16, 1>}, {pipeline_mode = #tpu.pipeline_mode<synchronous>, transform_indices = @transform_3, window_bounds = array<i64: 32, 32>}, {pipeline_mode = #tpu.pipeline_mode<synchronous>, transform_indices = @transform_4, window_bounds = array<i64: 1, 32>}, {transform_indices = @transform_5, window_bounds = array<i64: 2, 16, 32>}, {transform_indices = @transform_6, window_bounds = array<i64: 2, 1, 32>}, {transform_indices = @transform_7, window_bounds = array<i64: 2, 1, 32>}]} {
    %c0 = arith.constant 0 : index
    %c0_0 = arith.constant 0 : index
    %0 = vector.load %arg4[%c0, %c0_0] : memref<32x32xf32, #tpu.memory_space<vmem>>, vector<32x32xf32>
    %1 = arith.truncf %0 : vector<32x32xf32> to vector<32x32xbf16>
    %c0_1 = arith.constant 0 : index
    %c0_2 = arith.constant 0 : index
    %2 = vector.load %arg5[%c0_1, %c0_2] : memref<1x32xf32, #tpu.memory_space<vmem>>, vector<1x32xf32>
    %c0_3 = arith.constant 0 : index
    %c0_4 = arith.constant 0 : index
    %c0_5 = arith.constant 0 : index
    %3 = vector.load %arg1[%c0_3, %c0_4, %c0_5] : memref<2x16x16xbf16, #tpu.memory_space<vmem>>, vector<1x16x16xbf16>
    %4 = vector.shape_cast %3 : vector<1x16x16xbf16> to vector<16x16xbf16>
    %c0_6 = arith.constant 0 : index
    %c0_7 = arith.constant 0 : index
    %c0_8 = arith.constant 0 : index
    %5 = vector.load %arg2[%c0_6, %c0_7, %c0_8] : memref<2x16x32xf32, #tpu.memory_space<vmem>>, vector<1x16x32xf32>
    %6 = vector.shape_cast %5 : vector<1x16x32xf32> to vector<16x32xf32>
    %c0_9 = arith.constant 0 : index
    %c0_10 = arith.constant 0 : index
    %c0_11 = arith.constant 0 : index
    %7 = vector.load %arg3[%c0_9, %c0_10, %c0_11] : memref<2x16x1xf32, #tpu.memory_space<vmem>>, vector<1x16x1xf32>
    %8 = vector.shape_cast %7 : vector<1x16x1xf32> to vector<16x1xf32>
    %9 = arith.truncf %6 : vector<16x32xf32> to vector<16x32xbf16>
    %cst = arith.constant dense<0.000000e+00> : vector<16x32xf32>
    %10 = tpu.matmul %4, %9, %cst {dimension_numbers = #tpu.dot_dimension_numbers<[0], [0], [1], [1], [0, 1, 1, 1], [], []>} : vector<16x16xbf16>, vector<16x32xbf16>, vector<16x32xf32> -> vector<16x32xf32>
    %11 = arith.truncf %10 : vector<16x32xf32> to vector<16x32xbf16>
    %cst_12 = arith.constant dense<0.000000e+00> : vector<16x32xf32>
    %12 = tpu.matmul %11, %1, %cst_12 {dimension_numbers = #tpu.dot_dimension_numbers<[1], [0], [0], [1], [0, 0, 1, 1], [], []>} : vector<16x32xbf16>, vector<32x32xbf16>, vector<16x32xf32> -> vector<16x32xf32>
    %13 = vector.broadcast %2 : vector<1x32xf32> to vector<16x32xf32>
    %14 = arith.addf %12, %13 : vector<16x32xf32>
    %c0_13 = arith.constant 0 : index
    %c0_14 = arith.constant 0 : index
    %c0_15 = arith.constant 0 : index
    %15 = vector.load %arg6[%c0_13, %c0_14, %c0_15] : memref<2x16x32xf32, #tpu.memory_space<vmem>>, vector<1x16x32xf32>
    %16 = vector.shape_cast %15 : vector<1x16x32xf32> to vector<16x32xf32>
    %17 = vector.shape_cast %14 : vector<16x32xf32> to vector<1x16x32xf32>
    tpu.vector_store %arg6[%c0_13, %c0_14, %c0_15], %17 {strides = array<i32>} : memref<2x16x32xf32, #tpu.memory_space<vmem>>, vector<1x16x32xf32>,
    %18 = vector.broadcast %8 : vector<16x1xf32> to vector<16x32xf32>
    %19 = arith.mulf %14, %18 : vector<16x32xf32>
    %cst_16 = arith.constant dense<0.000000e+00> : vector<32xf32>
    %20 = vector.multi_reduction <add>, %19, %cst_16 [0] : vector<16x32xf32> to vector<32xf32>
    %21 = vector.shape_cast %20 : vector<32xf32> to vector<1x32xf32>
    %c0_17 = arith.constant 0 : index
    %c0_18 = arith.constant 0 : index
    %c0_19 = arith.constant 0 : index
    %22 = vector.load %arg7[%c0_17, %c0_18, %c0_19] : memref<2x1x32xf32, #tpu.memory_space<vmem>>, vector<1x1x32xf32>
    %23 = vector.shape_cast %22 : vector<1x1x32xf32> to vector<1x32xf32>
    %24 = vector.shape_cast %21 : vector<1x32xf32> to vector<1x1x32xf32>
    tpu.vector_store %arg7[%c0_17, %c0_18, %c0_19], %24 {strides = array<i32>} : memref<2x1x32xf32, #tpu.memory_space<vmem>>, vector<1x1x32xf32>,
    %25 = arith.mulf %19, %19 : vector<16x32xf32>
    %cst_20 = arith.constant dense<0.000000e+00> : vector<32xf32>
    %26 = vector.multi_reduction <add>, %25, %cst_20 [0] : vector<16x32xf32> to vector<32xf32>
    %27 = vector.shape_cast %26 : vector<32xf32> to vector<1x32xf32>
    %c0_21 = arith.constant 0 : index
    %c0_22 = arith.constant 0 : index
    %c0_23 = arith.constant 0 : index
    %28 = vector.load %arg8[%c0_21, %c0_22, %c0_23] : memref<2x1x32xf32, #tpu.memory_space<vmem>>, vector<1x1x32xf32>
    %29 = vector.shape_cast %28 : vector<1x1x32xf32> to vector<1x32xf32>
    %30 = vector.shape_cast %27 : vector<1x32xf32> to vector<1x1x32xf32>
    tpu.vector_store %arg8[%c0_21, %c0_22, %c0_23], %30 {strides = array<i32>} : memref<2x1x32xf32, #tpu.memory_space<vmem>>, vector<1x1x32xf32>,
    %c1 = arith.constant 1 : index
    %c0_24 = arith.constant 0 : index
    %c0_25 = arith.constant 0 : index
    %31 = vector.load %arg1[%c1, %c0_24, %c0_25] : memref<2x16x16xbf16, #tpu.memory_space<vmem>>, vector<1x16x16xbf16>
    %32 = vector.shape_cast %31 : vector<1x16x16xbf16> to vector<16x16xbf16>
    %c1_26 = arith.constant 1 : index
    %c0_27 = arith.constant 0 : index
    %c0_28 = arith.constant 0 : index
    %33 = vector.load %arg2[%c1_26, %c0_27, %c0_28] : memref<2x16x32xf32, #tpu.memory_space<vmem>>, vector<1x16x32xf32>
    %34 = vector.shape_cast %33 : vector<1x16x32xf32> to vector<16x32xf32>
    %c1_29 = arith.constant 1 : index
    %c0_30 = arith.constant 0 : index
    %c0_31 = arith.constant 0 : index
    %35 = vector.load %arg3[%c1_29, %c0_30, %c0_31] : memref<2x16x1xf32, #tpu.memory_space<vmem>>, vector<1x16x1xf32>
    %36 = vector.shape_cast %35 : vector<1x16x1xf32> to vector<16x1xf32>
    %37 = arith.truncf %34 : vector<16x32xf32> to vector<16x32xbf16>
    %cst_32 = arith.constant dense<0.000000e+00> : vector<16x32xf32>
    %38 = tpu.matmul %32, %37, %cst_32 {dimension_numbers = #tpu.dot_dimension_numbers<[0], [0], [1], [1], [0, 1, 1, 1], [], []>} : vector<16x16xbf16>, vector<16x32xbf16>, vector<16x32xf32> -> vector<16x32xf32>
    %39 = arith.truncf %38 : vector<16x32xf32> to vector<16x32xbf16>
    %cst_33 = arith.constant dense<0.000000e+00> : vector<16x32xf32>
    %40 = tpu.matmul %39, %1, %cst_33 {dimension_numbers = #tpu.dot_dimension_numbers<[1], [0], [0], [1], [0, 0, 1, 1], [], []>} : vector<16x32xbf16>, vector<32x32xbf16>, vector<16x32xf32> -> vector<16x32xf32>
    %41 = vector.broadcast %2 : vector<1x32xf32> to vector<16x32xf32>
    %42 = arith.addf %40, %41 : vector<16x32xf32>
    %c1_34 = arith.constant 1 : index
    %c0_35 = arith.constant 0 : index
    %c0_36 = arith.constant 0 : index
    %43 = vector.load %arg6[%c1_34, %c0_35, %c0_36] : memref<2x16x32xf32, #tpu.memory_space<vmem>>, vector<1x16x32xf32>
    %44 = vector.shape_cast %43 : vector<1x16x32xf32> to vector<16x32xf32>
    %45 = vector.shape_cast %42 : vector<16x32xf32> to vector<1x16x32xf32>
    tpu.vector_store %arg6[%c1_34, %c0_35, %c0_36], %45 {strides = array<i32>} : memref<2x16x32xf32, #tpu.memory_space<vmem>>, vector<1x16x32xf32>,
    %46 = vector.broadcast %36 : vector<16x1xf32> to vector<16x32xf32>
    %47 = arith.mulf %42, %46 : vector<16x32xf32>
    %cst_37 = arith.constant dense<0.000000e+00> : vector<32xf32>
    %48 = vector.multi_reduction <add>, %47, %cst_37 [0] : vector<16x32xf32> to vector<32xf32>
    %49 = vector.shape_cast %48 : vector<32xf32> to vector<1x32xf32>
    %c1_38 = arith.constant 1 : index
    %c0_39 = arith.constant 0 : index
    %c0_40 = arith.constant 0 : index
    %50 = vector.load %arg7[%c1_38, %c0_39, %c0_40] : memref<2x1x32xf32, #tpu.memory_space<vmem>>, vector<1x1x32xf32>
    %51 = vector.shape_cast %50 : vector<1x1x32xf32> to vector<1x32xf32>
    %52 = vector.shape_cast %49 : vector<1x32xf32> to vector<1x1x32xf32>
    tpu.vector_store %arg7[%c1_38, %c0_39, %c0_40], %52 {strides = array<i32>} : memref<2x1x32xf32, #tpu.memory_space<vmem>>, vector<1x1x32xf32>,
    %53 = arith.mulf %47, %47 : vector<16x32xf32>
    %cst_41 = arith.constant dense<0.000000e+00> : vector<32xf32>
    %54 = vector.multi_reduction <add>, %53, %cst_41 [0] : vector<16x32xf32> to vector<32xf32>
    %55 = vector.shape_cast %54 : vector<32xf32> to vector<1x32xf32>
    %c1_42 = arith.constant 1 : index
    %c0_43 = arith.constant 0 : index
    %c0_44 = arith.constant 0 : index
    %56 = vector.load %arg8[%c1_42, %c0_43, %c0_44] : memref<2x1x32xf32, #tpu.memory_space<vmem>>, vector<1x1x32xf32>
    %57 = vector.shape_cast %56 : vector<1x1x32xf32> to vector<1x32xf32>
    %58 = vector.shape_cast %55 : vector<1x32xf32> to vector<1x1x32xf32>
    tpu.vector_store %arg8[%c1_42, %c0_43, %c0_44], %58 {strides = array<i32>} : memref<2x1x32xf32, #tpu.memory_space<vmem>>, vector<1x1x32xf32>,
    return
  }
  func.func @transform_0(%arg0: i32) -> (i32, i32, i32) {
    %c0_i32 = arith.constant 0 : i32
    %c0_i32_0 = arith.constant 0 : i32
    %c0_i32_1 = arith.constant 0 : i32
    return %arg0, %c0_i32, %c0_i32_0 : i32, i32, i32
  }
  func.func @transform_1(%arg0: i32) -> (i32, i32, i32) {
    %c0_i32 = arith.constant 0 : i32
    %c0_i32_0 = arith.constant 0 : i32
    %c0_i32_1 = arith.constant 0 : i32
    return %arg0, %c0_i32, %c0_i32_0 : i32, i32, i32
  }
  func.func @transform_2(%arg0: i32) -> (i32, i32, i32) {
    %c0_i32 = arith.constant 0 : i32
    %c0_i32_0 = arith.constant 0 : i32
    %c0_i32_1 = arith.constant 0 : i32
    return %arg0, %c0_i32, %c0_i32_0 : i32, i32, i32
  }
  func.func @transform_3(%arg0: i32) -> (i32, i32) {
    %c0_i32 = arith.constant 0 : i32
    %c0_i32_0 = arith.constant 0 : i32
    %c0_i32_1 = arith.constant 0 : i32
    return %c0_i32, %c0_i32_0 : i32, i32
  }
  func.func @transform_4(%arg0: i32) -> (i32, i32) {
    %c0_i32 = arith.constant 0 : i32
    %c0_i32_0 = arith.constant 0 : i32
    %c0_i32_1 = arith.constant 0 : i32
    return %c0_i32, %c0_i32_0 : i32, i32
  }
  func.func @transform_5(%arg0: i32) -> (i32, i32, i32) {
    %c0_i32 = arith.constant 0 : i32
    %c0_i32_0 = arith.constant 0 : i32
    %c0_i32_1 = arith.constant 0 : i32
    return %arg0, %c0_i32, %c0_i32_0 : i32, i32, i32
  }
  func.func @transform_6(%arg0: i32) -> (i32, i32, i32) {
    %c0_i32 = arith.constant 0 : i32
    %c0_i32_0 = arith.constant 0 : i32
    %c0_i32_1 = arith.constant 0 : i32
    return %arg0, %c0_i32, %c0_i32_0 : i32, i32, i32
  }
  func.func @transform_7(%arg0: i32) -> (i32, i32, i32) {
    %c0_i32 = arith.constant 0 : i32
    %c0_i32_0 = arith.constant 0 : i32
    %c0_i32_1 = arith.constant 0 : i32
    return %arg0, %c0_i32, %c0_i32_0 : i32, i32, i32
  }
}

</mosaic_0001>

<bundles_post_ra>
// kernel: tpu_custom_call.1
= control target key start
LH: loop header
LB: loop body
LE: loop exit
PB: predicated region body
PF: predicated region fallthrough
CT: control target
= control target key end

     0   :  { %s1654_s0 = inlined_call_operand.hbm [shape: bf16[4,16,16], index: 0, kind: input, shape index: {}]   ;;  %s1655_s1 = inlined_call_operand.vmem [shape: f32[4,16,32], index: 1, kind: input, shape index: {}]   ;;  %s1656_s2 = inlined_call_operand.vmem [shape: f32[4,16,1], index: 2, kind: input, shape index: {}]   ;;  %s1657_s3 = inlined_call_operand.hbm [shape: f32[32,32], index: 3, kind: input, shape index: {}]   ;;  %s1658_s4 = inlined_call_operand.vmem [shape: f32[1,32], index: 4, kind: input, shape index: {}]   ;;  %s1659_s5 = inlined_call_operand.hbm [shape: f32[4,16,32], index: 5, kind: output, shape index: {0}]   ;;  %s1660_s6 = inlined_call_operand.hbm [shape: f32[4,1,32], index: 6, kind: output, shape index: {1}]   ;;  %s1661_s7 = inlined_call_operand.hbm [shape: f32[4,1,32], index: 7, kind: output, shape index: {2}]  }
   0x1   :  { %1667 = sst [smem:[#allocation15_spill]] %s1657_s3 }
   0x2   :  { %13 = vsyncpa [#allocation3], 0 }
   0x3   :  { %15 = vsyncpa [#allocation3 + $0x1], 0 }
   0x4   :  { %16 = vsyncpa [#allocation6], 0 }
   0x5   :  { %17 = vsyncpa [#allocation4], 0 }
   0x6   :  { %19 = vsyncpa [#allocation4 + $0x1], 0 }
   0x7   :  { %20 = vsyncpa [#allocation9], 0 }
   0x8   :  { %22 = vsyncpa [#allocation9 + $0x1], 0  ;;  %s1354_s24 = smov 0   ;;  %s1356_s25 = smov 0  }
   0x9   :  { %s1358_s26 = smov 0   ;;  %s1360_s27 = smov 0  }
   0xa LB: > { %s1375_s28 = sadd.s32 4294967295, %s1296_s27   ;;  %s1662_s29 = sadd.s32 4294967294, %s1296_s27   ;;  %s1296_s27 = sphi %s1360_s27, %s1687_s27   ;;  %s1292_s26 = sphi %s1358_s26, %s1686_s26   ;;  %s1288_s25 = sphi %s1356_s25, %s1685_s25   ;;  %s1284_s24 = sphi %s1354_s24, %s1684_s24  }
   0xb   : > { %p48_p0 = scmp.ne.s32.totalorder %s1288_s25, %s1284_s24  ;;  %p1663_p1 = scmp.eq.s32.totalorder %s1375_s28, 0 }
   0xc   : > { %p172_p3 = scmp.eq.s32.totalorder %s1662_s29, 1  ;;  %p942_p5 = scmp.ge.s32.totalorder %s1296_s27, 1 }
   0xd   : > { %p1386_p4 = por %p1663_p1, %p48_p0  ;;  %p231_p7 = scmp.lt.s32.totalorder %s1296_s27, 3 }
   0xe   : > { %p1391_p6 = por %p172_p3, %p48_p0  ;;  %s1298_s10 = smov [#allocation5]  }
   0xf   : > { %s1668_s30 = scalar_select %p1386_p4, 1, 0 }
  0x10   : > { %s1669_s8 = scalar_select %p1391_p6, 1, 0 }
  0x11   : > { %p1396_p8 = pnand %p942_p5, %p231_p7  ;;  %s243_s11 = sshll.u32 %s1298_s10, 4  ;;  %s244_s11 = int_to_ptr.vmem [resolvable:$true] %s243_s11 }
  0x12   : > { %s1410_s13 = sadd.s32 1, %s1296_s27   ;;  %s35_s14 = sadd.s32 1, %s1292_s26 }
  0x13   : > { %s1670_s9 = scalar_select %p1396_p8, 1, 0 }
  0x14   : > { %p1048_p9 = pneg %p1396_p8  ;;  %s32_s15 = ssub.s32 %s1296_s27, %s1410_s13 }
  0x15   : > { %s1129_s16 = scalar_lea.vmem %s244_s11, 512  ;;  %p1137_p5 = scmp.lt.s32.totalorder %s244_s11, %s244_s11 }
  0x16   : > { %p1405_p11 = pnand %p1048_p9, %p1663_p1  ;;  %p1130_p13 = scmp.ne.s32.totalorder %s244_s11, %s1129_s16 }
  0x17   : > { %p1138_p7 = scmp.lt.s32.totalorder %s1129_s16, %s1129_s16 }
  0x18   : > { %p1120_p12 = pneg %p1405_p11 }
  0x19   : > { %p1139_p10 = por %p1138_p7, %p1137_p5 }
  0x1a   : > { %p1132_p0 = pnand %p1130_p13, %p1120_p12 }
  0x1c   : > { %p1133_p3 = pneg %p1132_p0 }
  0x1e   : > { %p1140_p2 = pnand %p1139_p10, %p1133_p3 }
  0x20   : > { %1143 = shalt.err (!%p1140_p2)
}
  0x21   : > { %s1299_s17 = smov 128   ;;  %s1300_s18 = smov 8  }
  0x22   : > { %s1672_s3 = sld [smem:[#allocation15_spill]]  ;;  %p33_p9 = scmp.eq.s32.totalorder %s32_s15, 0 }
  0x23   : > { %p42_p12 = scmp.ne.s32.totalorder %s1292_s26, %s1288_s25  ;;  %p43_p10 = scmp.eq.s32.totalorder %s1296_s27, 0 }
  0x24   : > { %p1067_p2 = scmp.lt.s32.totalorder %s1296_s27, 2  ;;  %p1673_p0 = scmp.eq.s32.totalorder %s1375_s28, 1 }
  0x25   : > { %s1427_s21 = scalar_select %p33_p9, %s1292_s26, %s35_s14  }
  0x26   : > { %p44_p13 = por %p43_p10, %p42_p12  ;;  %p1431_p3 = por %p1673_p0, %p42_p12 }
  0x27   : > { %s260_s23 = sand.u32 1, %s1292_s26   ;;  %s991_s10 = sshll.u32 %s1296_s27, 8 }
  0x28   : > { %1051 = dma.hbm_to_vmem [thread:$0]  (!%p1405_p11), %s1672_s3, 512, %s244_s11, [#allocation6], %s1299_s17, %s1299_s17, %s1300_s18  }
  0x29   : > { %s1674_s22 = scalar_select %p1431_p3, 1, 0 }
  0x2a   : > { %s945_s16 = sshll.u32 %s260_s23, 4  ;;  %s1440_s19 = scalar_lea.hbm %s1654_s0, %s991_s10 }
  0x2b   : > { %s264_s11 = scalar_lea.vmem [#allocation2], %s945_s16  ;;  %p1442_p11 = pnand %p1067_p2, %p44_p13 }
  0x2c   : > { %s272_s14 = sshll.u32 %s264_s11, 4  ;;  %s1448_s17 = scalar_lea.sflag [#allocation3], %s260_s23  ;;  %s1446_s14 = int_to_ptr.vmem [resolvable:$true] %s272_s14 }
  0x2d   : > { %s1144_s18 = scalar_lea.hbm %s1440_s19, 256  ;;  %p1146_p7 = pneg %p1442_p11 }
  0x2e   : > { %p1145_p5 = scmp.ne.s32.totalorder %s1440_s19, %s1144_s18  ;;  %s1149_s10 = scalar_lea.hbm %s1654_s0, 512 }
  0x2f   : > { %p1150_p10 = scmp.lt.s32.totalorder %s1440_s19, %s1654_s0  ;;  %p1151_p2 = scmp.lt.s32.totalorder %s1149_s10, %s1144_s18 }
  0x30   : > { %p1147_p9 = pnand %p1146_p7, %p1145_p5 }
  0x31   : > { %p1152_p13 = por %p1151_p2, %p1150_p10 }
  0x32   : > { %p1148_p12 = pneg %p1147_p9 }
  0x34   : > { %p1153_p0 = pnand %p1152_p13, %p1148_p12 }
  0x36   : > { %1156 = shalt.err (!%p1153_p0)
}
  0x37   : > { %s1157_s23 = scalar_lea.vmem %s1446_s14, 256  ;;  %s1301_s11 = smov [#allocation2]  }
  0x38   : > { %p1158_p1 = scmp.ne.s32.totalorder %s1446_s14, %s1157_s23  ;;  %s1162_s3 = sshll.u32 %s1301_s11, 4  ;;  %s1163_s3 = int_to_ptr.vmem [resolvable:$false] %s1162_s3 }
  0x39   : > { %s1164_s29 = scalar_lea.vmem %s1163_s3, 512  ;;  %p1165_p9 = scmp.lt.s32.totalorder %s1446_s14, %s1163_s3 }
  0x3a   : > { %p1160_p6 = pnand %p1158_p1, %p1146_p7  ;;  %p1166_p3 = scmp.lt.s32.totalorder %s1164_s29, %s1157_s23 }
  0x3c   : > { %p1161_p5 = pneg %p1160_p6  ;;  %p1167_p4 = por %p1166_p3, %p1165_p9 }
  0x3e   : > { %p1168_p8 = pnand %p1167_p4, %p1161_p5 }
  0x40   : > { %1171 = shalt.err (!%p1168_p8)
}
  0x41   : > { %s1302_s18 = smov 64   ;;  %s1303_s20 = smov 4  }
  0x42   : > { %1055 = dma.hbm_to_vmem [thread:$0]  (!%p1442_p11), %s1440_s19, 256, %s1446_s14, %s1448_s17, %s1302_s18, %s1302_s18, %s1303_s20  }
  0x43   : > { %p1676_p1 = scmp.ne.s32.totalorder %s1670_s9, 0 }
  0x44   : > { %s1472_s10 = sand.u32 (!%p1676_p1), 1, %s1288_s25   ;;  %p1677_p4 = scmp.ne.s32.totalorder (!%p1676_p1), %s1668_s30, 0 }
  0x45   : > { %304 = sbr.rel (%p1676_p1) target bundleno = 649 (0x289), region = 40  ;;  %s950_s3 = sshll.u32 (!%p1676_p1), %s1472_s10, 4 }
  0x46   : > { %s307_s16 = scalar_lea.sflag (!%p1676_p1), [#allocation3], %s1472_s10  ;;  %s310_s12 = scalar_lea.vmem (!%p1676_p1), [#allocation2], %s950_s3 }
  0x4a   : > { %1267 = dma.done.wait (%p1677_p4), %s307_s16, 256  }
  0x4b   : > { %1269 = vsyncadd (%p1677_p4), %s307_s16, 4294967040  ;;  %p1678_p6 = scmp.eq.s32.totalorder %s1375_s28, 0 }
  0x4d   : > { %1271 = dma.done.wait (%p1678_p6), [#allocation6], 512   ;;  %p1679_p8 = pmov %p1678_p6 }
  0x4e   : > { %s955_s9 = sshll.u32 %s1375_s28, 1  ;;  %v1304_v0 = vmov 0.0   ;;  %vm1305_vm0 = vmmov 0   ;;  %v1116_v1 = vld [vmem:[%s310_s12] sm:$0xff]   ;;  %v1117_v2 = vld [vmem:[%s310_s12 + $0x8] sm:$0xff]   ;;  %vm422_vm1 = vcmask 130048  }
  0x4f   : > { %1273 = vsyncadd (%p1679_p8), [#allocation6], 4294966784  ;;  %1008 = vmatprep.subr.bf16.mxu0 %v1304_v0  ;;  %p369_p3 = scmp.lt.s32.totalorder %s955_s9, 3  ;;  %1010 = vmatprep.mubr.msk.bf16.mxu0 %vm1305_vm0, %v1304_v0  ;;  %v388_v6 = vld [vmem:[#allocation5 + $0x10] sm:$0xff]  ;;  %v389_v7 = vld [vmem:[#allocation5 + $0x18] sm:$0xff]  ;;  %v1306_v17 = vmov 0  }
  0x50   : > { %1014 = vmatprep.subr.bf16.mxu1 %v1304_v0  ;;  %1018 = vmatprep.mubr.msk.bf16.mxu1 %vm1305_vm0, %v1304_v0  ;;  %v391_v8 = vpack.c.bf16 %v389_v7, %v388_v6  ;;  %v386_v14 = vld [vmem:[#allocation5] sm:$0xff]  ;;  %v387_v15 = vld [vmem:[#allocation5 + $0x8] sm:$0xff]  ;;  %vm474_vm2 = vcmask 261120   ;;  %s952_s29 = sshll.u32 %s1472_s10, 5  ;;  %s995_s12 = sshll.u32 %s1375_s28, 9 }
  0x51   : > { %s1689_s9 = smov (!%p369_p3, %s955_s9), 3  ;;  %406 = vxpose.xlu0.c.b16.start.end [1/1] (short) (narrow) %v1116_v1, 16  ;;  %v390_v16 = vpack.c.bf16 %v387_v15, %v386_v14  ;;  %1114 = vset.pattern.permute.xlu1 %v1306_v17  ;;  %v963_v32 = vld [vmem:[%s1658_s4] ss:$0 sm:$0xff]  ;;  %s1508_s3 = scalar_lea.vmem [#allocation7], %s952_s29 }
  0x52   : > { %s992_s30 = sshll.u32 %s1689_s9, 4  ;;  %1015 = vmatpush3.bf16.msra.mxu1 %v391_v8  ;;  %s741_s16 = sshll.u32 %s1508_s3, 4  ;;  %s1519_s16 = int_to_ptr.vmem [resolvable:$true] %s741_s16 }
  0x53   : > { %s373_s15 = scalar_lea.vmem %s1655_s1, %s992_s30  ;;  %1016 = vmatprep.subr.bf16.mxu1 %v1304_v0  ;;  %s380_s11 = scalar_lea.vmem %s1656_s2, %s992_s30 }
  0x54   : > { %v395_v3 = vld [vmem:[%s373_s15] sm:$0xff]  ;;  %v396_v4 = vld [vmem:[%s373_s15 + $0x8] sm:$0xff]  ;;  %v967_v9 = vld [vmem:[%s373_s15 + $0x10] sm:$0xff]  ;;  %s1527_s19 = scalar_lea.hbm %s1659_s5, %s995_s12  ;;  %s717_s14 = scalar_lea.sflag [#allocation4], %s1472_s10 }
  0x55   : > { %v399_v5 = vpack.c.bf16 %v396_v4, %v395_v3  ;;  %572 = vxpose.xlu0.c.b16.start.end [1/1] (short) (narrow) %v1117_v2, 16  ;;  %v968_v10 = vld [vmem:[%s373_s15 + $0x18] sm:$0xff]  ;;  %v397_v18 = vld [vmem:[%s380_s11] sm:$0xff]  ;;  %v969_v19 = vld [vmem:[%s380_s11 + $0x10] sm:$0xff]  ;;  %s1172_s15 = scalar_lea.vmem %s1519_s16, 512  ;;  %p1680_p7 = scmp.ne.s32.totalorder %s1674_s22, 0 }
  0x56   : > { %v565_v11 = vpack.c.bf16 %v968_v10, %v967_v9  ;;  %1017 = vmatpush3.bf16.msra.mxu1 %v390_v16  ;;  %523 = vperm.xlu1 %1114, %v397_v18   ;;  %v398_v20 = vld [vmem:[%s380_s11 + $0x8] sm:$0xff]  ;;  %v970_v21 = vld [vmem:[%s380_s11 + $0x18] sm:$0xff]  ;;  %p1173_p11 = scmp.ne.s32.totalorder %s1519_s16, %s1172_s15  ;;  %s1307_s17 = smov [#allocation7]  }
  0x57   : > { %1009 = vmatpush3.bf16.msra.mxu0 %v399_v5  ;;  %1028 = vmatprep.subr.bf16.mxu1 %v1304_v0  ;;  %s1176_s23 = sshll.u32 %s1307_s17, 4  ;;  %s1177_s23 = int_to_ptr.vmem [resolvable:$false] %s1176_s23 }
  0x58   : > { %1022 = vmatprep.subr.bf16.mxu0 %v1304_v0  ;;  %p1174_p12 = pnand %p1173_p11, %p1680_p7  ;;  %s1178_s11 = scalar_lea.vmem %s1177_s23, 1024 }
  0x59   : > { %p1179_p2 = scmp.lt.s32.totalorder %s1519_s16, %s1177_s23  ;;  %p1180_p13 = scmp.lt.s32.totalorder %s1178_s11, %s1172_s15 }
  0x5a   : > { %528 = vperm.xlu1 %1114, %v398_v20   ;;  %p1175_p10 = pneg %p1174_p12 }
  0x5b   : > { %p1181_p0 = por %p1180_p13, %p1179_p2 }
  0x5d   : > { %p1182_p5 = pnand %p1181_p0, %p1175_p10 }
  0x5e   : > { %1115 = vset.pattern.permute.xlu0 %v1306_v17  ;;  %687 = vperm.xlu1 %1114, %v970_v21  }
  0x5f   : > { %682 = vperm.xlu0 %1115, %v969_v19  }
  0xb3   : > { %v414_v12 = vpop.trf.xlu0 }
  0xb4   : > { %1011 = vmatmul.mubr.msk.bf16.vlgmr.msra.gmra.mxu0 %vm422_vm1, %v414_v12 }
  0xb5   : > { %1023 = vmatpush3.bf16.msra.mxu0 %v565_v11  ;;  %1024 = vmatprep.mubr.msk.bf16.mxu0 %vm1305_vm0, %v1304_v0 }
  0xb7   : > { %v580_v13 = vpop.trf.xlu0 }
  0xbc   : > { %1025 = vmatmul.mubr.msk.bf16.vlgmr.msra.gmra.mxu0 %vm422_vm1, %v580_v13 }
  0xd1   : > { %v524_v33 = vpop.permute.xlu1 %523 }
  0xd5   : > { %v529_v40 = vpop.permute.xlu1 %528 }
  0xd9   : > { %v688_v61 = vpop.permute.xlu1 %687 }
  0xda   : > { %v683_v45 = vpop.permute.xlu0 %682 }
 0x174   : > { %v460_v22 = vpop.f32.mrf.mxu0 }
 0x176   : > { %v1012_v23 = vpop.f32.mrf.mxu0 }
 0x178   : > { %v463_v24 = vpop.f32.mrf.mxu0 }
 0x179   : > { %v467_v25 = vpack.c.bf16 %v463_v24, %v460_v22 }
 0x17a   : > { %v1013_v26 = vpop.f32.mrf.mxu0 }
 0x17b   : > { %1019 = vmatmul.mubr.msk.bf16.vlgmr.msra.gmra.mxu1 %vm474_vm2, %v467_v25 }
 0x17c   : > { %1029 = vmatpush3.bf16.msra.mxu1 %v391_v8  ;;  %v625_v27 = vpop.f32.mrf.mxu0  ;;  %1032 = vmatprep.mubr.msk.bf16.mxu1 %vm1305_vm0, %v1304_v0 }
 0x17d   : > { %1030 = vmatprep.subr.bf16.mxu1 %v1304_v0 }
 0x17e   : > { %v1026_v28 = vpop.f32.mrf.mxu0 }
 0x180   : > { %1031 = vmatpush3.bf16.msra.mxu1 %v390_v16  ;;  %v628_v29 = vpop.f32.mrf.mxu0 }
 0x181   : > { %v632_v30 = vpack.c.bf16 %v628_v29, %v625_v27 }
 0x182   : > { %v1027_v31 = vpop.f32.mrf.mxu0 }
 0x183   : > { %1033 = vmatmul.mubr.msk.bf16.vlgmr.msra.gmra.mxu1 %vm474_vm2, %v632_v30 }
 0x23b   : > { %v512_v34 = vpop.f32.mrf.mxu1 }
 0x23c   : > { %v513_v35 = vadd.f32 %v963_v32, %v512_v34 }
 0x23d   : > { %v1020_v36 = vpop.f32.mrf.mxu1 }
 0x23e   : > { %519 = vst.msk [vmem:[%s1508_s3] sm:$0xff] %vm474_vm2, %v513_v35  ;;  %v531_v37 = vmul.f32 %v524_v33, %v513_v35 }
 0x23f   : > { %v515_v38 = vpop.f32.mrf.mxu1 }
 0x240   : > { %v516_v39 = vadd.f32 %v963_v32, %v515_v38  ;;  %v544_v42 = vmul.f32 %v531_v37, %v531_v37  ;;  %v533_v46 = vsel %vm474_vm2, %v531_v37, 0.0 }
 0x241   : > { %v1021_v41 = vpop.f32.mrf.mxu1 }
 0x242   : > { %520 = vst.msk [vmem:[%s1508_s3 + $0x8] sm:$0xff] %vm474_vm2, %v516_v39  ;;  %v532_v43 = vmul.f32 %v529_v40, %v516_v39  ;;  %v546_v52 = vsel %vm474_vm2, %v544_v42, 0.0 }
 0x243   : > { %v670_v44 = vpop.f32.mrf.mxu1 }
 0x244   : > { %v534_v47 = vsel %vm474_vm2, %v532_v43, 0.0  ;;  %v545_v48 = vmul.f32 %v532_v43, %v532_v43  ;;  %v671_v49 = vadd.f32 %v963_v32, %v670_v44 }
 0x245   : > { %v535_v50 = vadd.f32 %v534_v47, %v533_v46  ;;  %v1034_v51 = vpop.f32.mrf.mxu1 }
 0x246   : > { %v547_v53 = vsel %vm474_vm2, %v545_v48, 0.0  ;;  %974 = vst.msk [vmem:[%s1508_s3 + $0x10] sm:$0xff] %vm474_vm2, %v671_v49  ;;  %v690_v54 = vmul.f32 %v683_v45, %v671_v49 }
 0x247   : > { %v536_v55 = vrot.slane %v535_v50, 4  ;;  %v548_v56 = vadd.f32 %v547_v53, %v546_v52  ;;  %v673_v57 = vpop.f32.mrf.mxu1 }
 0x248   : > { %v674_v58 = vadd.f32 %v963_v32, %v673_v57  ;;  %v703_v63 = vmul.f32 %v690_v54, %v690_v54 }
 0x249   : > { %v537_v59 = vadd.f32 %v536_v55, %v535_v50  ;;  %v549_v60 = vrot.slane %v548_v56, 4  ;;  %v1035_v62 = vpop.f32.mrf.mxu1 }
 0x24a   : > { %975 = vst.msk [vmem:[%s1508_s3 + $0x18] sm:$0xff] %vm474_vm2, %v674_v58  ;;  %v691_v0 = vmul.f32 %v688_v61, %v674_v58 }
 0x24b   : > { %v538_v1 = vrot.slane %v537_v59, 2  ;;  %v550_v2 = vadd.f32 %v549_v60, %v548_v56 }
 0x24c   : > { %1185 = shalt.err (!%p1182_p5)
}
 0x24d   : > { %s1186_s29 = scalar_lea.hbm %s1527_s19, 512  ;;  %s1190_s3 = scalar_lea.hbm %s1659_s5, 1024 }
 0x24e   : > { %p1187_p9 = scmp.ne.s32.totalorder %s1527_s19, %s1186_s29  ;;  %p1191_p6 = scmp.lt.s32.totalorder %s1527_s19, %s1659_s5 }
 0x24f   : > { %p1192_p8 = scmp.lt.s32.totalorder %s1190_s3, %s1186_s29 }
 0x250   : > { %p1188_p1 = pnand %p1187_p9, %p1680_p7 }
 0x251   : > { %p1193_p3 = por %p1192_p8, %p1191_p6 }
 0x252   : > { %p1189_p4 = pneg %p1188_p1 }
 0x254   : > { %p1194_p11 = pnand %p1193_p3, %p1189_p4 }
 0x256   : > { %1197 = shalt.err (!%p1194_p11)
}
 0x257   : > { %s1308_s30 = smov 128   ;;  %s1309_s15 = smov 8   ;;  %v692_v3 = vsel %vm474_vm2, %v690_v54, 0.0  ;;  %v693_v4 = vsel %vm474_vm2, %v691_v0, 0.0  ;;  %v704_v5 = vmul.f32 %v691_v0, %v691_v0  ;;  %v539_v6 = vadd.f32 %v538_v1, %v537_v59 }
 0x258   : > { %1042 = dma.vmem_to_hbm [thread:$0]  (%p1680_p7), %s1519_s16, 512, %s1527_s19, %s717_s14, %s1308_s30, %s1308_s30, %s1309_s15   ;;  %v551_v7 = vrot.slane %v550_v2, 2  ;;  %v694_v8 = vadd.f32 %v693_v4, %v692_v3  ;;  %v705_v9 = vsel %vm474_vm2, %v703_v63, 0.0  ;;  %vm542_vm3 = vcmask 253952  }
 0x259   : > { %s953_s17 = sshll.u32 %s1472_s10, 1  ;;  %v706_v10 = vsel %vm474_vm2, %v704_v5, 0.0  ;;  %v540_v11 = vrot.slane %v539_v6, 1  ;;  %s721_s10 = sand.u32 1, %s1375_s28  }
 0x25a   : > { %v552_v12 = vadd.f32 %v551_v7, %v550_v2  ;;  %v695_v13 = vrot.slane %v694_v8, 4  ;;  %v707_v14 = vadd.f32 %v706_v10, %v705_v9  ;;  %s359_s16 = scalar_lea.vmem [#allocation8], %s953_s17  ;;  %s996_s19 = sshll.u32 %s1375_s28, 5 }
 0x25b   : > { %v541_v15 = vadd.f32 %v540_v11, %v539_v6  ;;  %s1562_s14 = scalar_lea.vmem [#allocation10], %s953_s17  ;;  %s757_s23 = sshll.u32 %s359_s16, 4  ;;  %s1572_s23 = int_to_ptr.vmem [resolvable:$true] %s757_s23 }
 0x25c   : > { %v553_v16 = vrot.slane %v552_v12, 1  ;;  %v696_v17 = vadd.f32 %v695_v13, %v694_v8  ;;  %v708_v18 = vrot.slane %v707_v14, 4  ;;  %s1569_s18 = scalar_lea.hbm %s1660_s6, %s996_s19  ;;  %s773_s20 = sshll.u32 %s1562_s14, 4  ;;  %s1580_s20 = int_to_ptr.vmem [resolvable:$true] %s773_s20 }
 0x25d   : > { %543 = vst.msk [vmem:[%s359_s16] sm:$0x1] %vm542_vm3, %v541_v15  ;;  %s1578_s12 = scalar_lea.hbm %s1661_s7, %s996_s19  ;;  %s1582_s9 = scalar_lea.sflag [#allocation9], %s721_s10 }
 0x25e   : > { %v554_v19 = vadd.f32 %v553_v16, %v552_v12  ;;  %v697_v20 = vrot.slane %v696_v17, 2  ;;  %v709_v21 = vadd.f32 %v708_v18, %v707_v14  ;;  %s1198_s30 = scalar_lea.vmem %s1572_s23, 32  ;;  %s1310_s15 = smov [#allocation8]  }
 0x25f   : > { %p1199_p12 = scmp.ne.s32.totalorder %s1572_s23, %s1198_s30  ;;  %s1202_s17 = sshll.u32 %s1310_s15, 4  ;;  %s1203_s17 = int_to_ptr.vmem [resolvable:$false] %s1202_s17 }
 0x260   : > { %v698_v22 = vadd.f32 %v697_v20, %v696_v17  ;;  %v710_v23 = vrot.slane %v709_v21, 2  ;;  %555 = vst.msk [vmem:[%s1562_s14] sm:$0x1] %vm542_vm3, %v554_v19  ;;  %s1204_s11 = scalar_lea.vmem %s1203_s17, 64  ;;  %p1205_p13 = scmp.lt.s32.totalorder %s1572_s23, %s1203_s17 }
 0x261   : > { %p1200_p10 = pnand %p1199_p12, %p1680_p7  ;;  %p1206_p0 = scmp.lt.s32.totalorder %s1204_s11, %s1198_s30 }
 0x262   : > { %v699_v24 = vrot.slane %v698_v22, 1  ;;  %v711_v25 = vadd.f32 %v710_v23, %v709_v21 }
 0x263   : > { %p1201_p2 = pneg %p1200_p10  ;;  %p1207_p5 = por %p1206_p0, %p1205_p13 }
 0x264   : > { %v700_v26 = vadd.f32 %v699_v24, %v698_v22  ;;  %v712_v27 = vrot.slane %v711_v25, 1 }
 0x265   : > { %p1208_p9 = pnand %p1207_p5, %p1201_p2 }
 0x266   : > { %v713_v28 = vadd.f32 %v712_v27, %v711_v25  ;;  %976 = vst.msk [vmem:[%s359_s16 + $0x1] sm:$0x1] %vm542_vm3, %v700_v26 }
 0x267   : > { %1211 = shalt.err (!%p1208_p9)
}
 0x268   : > { %s1212_s16 = scalar_lea.hbm %s1569_s18, 32  ;;  %s1216_s29 = scalar_lea.hbm %s1660_s6, 64 }
 0x269   : > { %p1213_p1 = scmp.ne.s32.totalorder %s1569_s18, %s1212_s16  ;;  %p1217_p8 = scmp.lt.s32.totalorder %s1569_s18, %s1660_s6 }
 0x26a   : > { %p1218_p3 = scmp.lt.s32.totalorder %s1216_s29, %s1212_s16 }
 0x26b   : > { %p1214_p4 = pnand %p1213_p1, %p1680_p7 }
 0x26c   : > { %p1219_p11 = por %p1218_p3, %p1217_p8 }
 0x26d   : > { %p1215_p6 = pneg %p1214_p4 }
 0x26f   : > { %p1220_p12 = pnand %p1219_p11, %p1215_p6 }
 0x271   : > { %1223 = shalt.err (!%p1220_p12)
}
 0x272   : > { %s1311_s30 = smov 16   ;;  %s1312_s15 = smov 1   ;;  %977 = vst.msk [vmem:[%s1562_s14 + $0x1] sm:$0x1] %vm542_vm3, %v713_v28 }
 0x273   : > { %1043 = dma.vmem_to_hbm [thread:$0]  (%p1680_p7), %s1572_s23, 32, %s1569_s18, %s1582_s9, %s1311_s30, %s1311_s30, %s1312_s15  }
 0x274   : > { %s1224_s17 = scalar_lea.vmem %s1580_s20, 32  ;;  %s1313_s11 = smov [#allocation10]  }
 0x275   : > { %p1225_p10 = scmp.ne.s32.totalorder %s1580_s20, %s1224_s17  ;;  %s1228_s16 = sshll.u32 %s1313_s11, 4  ;;  %s1229_s16 = int_to_ptr.vmem [resolvable:$false] %s1228_s16 }
 0x276   : > { %s1230_s10 = scalar_lea.vmem %s1229_s16, 64  ;;  %p1231_p0 = scmp.lt.s32.totalorder %s1580_s20, %s1229_s16 }
 0x277   : > { %p1226_p2 = pnand %p1225_p10, %p1680_p7  ;;  %p1232_p5 = scmp.lt.s32.totalorder %s1230_s10, %s1224_s17 }
 0x279   : > { %p1227_p13 = pneg %p1226_p2  ;;  %p1233_p9 = por %p1232_p5, %p1231_p0 }
 0x27b   : > { %p1234_p1 = pnand %p1233_p9, %p1227_p13 }
 0x27d   : > { %1237 = shalt.err (!%p1234_p1)
}
 0x27e   : > { %s1238_s23 = scalar_lea.hbm %s1578_s12, 32  ;;  %s1242_s19 = scalar_lea.hbm %s1661_s7, 64 }
 0x27f   : > { %p1239_p4 = scmp.ne.s32.totalorder %s1578_s12, %s1238_s23  ;;  %p1243_p3 = scmp.lt.s32.totalorder %s1578_s12, %s1661_s7 }
 0x280   : > { %p1244_p11 = scmp.lt.s32.totalorder %s1242_s19, %s1238_s23 }
 0x281   : > { %p1240_p6 = pnand %p1239_p4, %p1680_p7 }
 0x282   : > { %p1245_p12 = por %p1244_p11, %p1243_p3 }
 0x283   : > { %p1241_p8 = pneg %p1240_p6 }
 0x285   : > { %p1246_p10 = pnand %p1245_p12, %p1241_p8 }
 0x287   : > { %1249 = shalt.err (!%p1246_p10)
}
 0x288   : > { %1044 = dma.vmem_to_hbm [thread:$0]  (%p1680_p7), %s1580_s20, 32, %s1578_s12, %s1582_s9, %s1311_s30, %s1311_s30, %s1312_s15  }
 0x289 PF: > { %s788_s3 = sand.u32 1, %s1284_s24   ;;  %p1681_p2 = scmp.ne.s32.totalorder %s1669_s8, 0 }
 0x28a   : > { %p1682_p13 = scmp.ge.s32.totalorder %s1296_s27, 2  ;;  %s789_s17 = scalar_lea.sflag [#allocation4], %s788_s3 }
 0x28c   : > { %p1057_p0 = pnand %p1682_p13, %p1681_p2 }
 0x28e   : > { %p1058_p5 = pneg %p1057_p0 }
 0x290   : > { %1275 = dma.done.wait (%p1058_p5), %s789_s17, 512  }
 0x291   : > { %1277 = vsyncadd (%p1058_p5), %s789_s17, 4294966784  ;;  %s1683_s22 = sadd.s32 4294967294, %s1296_s27  }
 0x292   : > { %s797_s11 = sand.u32 1, %s1683_s22  }
 0x293   : > { %s798_s16 = scalar_lea.sflag [#allocation9], %s797_s11 }
 0x294   : > { %1279 = dma.done.wait (%p1058_p5), %s798_s16, 64  }
 0x295   : > { %1281 = vsyncadd (%p1058_p5), %s798_s16, 4294967232  ;;  %p25_p7 = scmp.ge.s32.totalorder %s1410_s13, 4   ;;  %s1684_s24 = smov %s1288_s25 }
 0x296   : > { %s1685_s25 = smov %s1292_s26  ;;  %s1686_s26 = smov %s1427_s21 }
 0x297   : > { %s1687_s27 = smov %s1410_s13  ;;  %27 = sbr.rel (!%p25_p7) target bundleno = 10 (0xa), region = 133 }
 0x29c   :  { %812 = vsyncpa [#allocation3], 1 }
 0x29d   :  { %814 = vsyncpa [#allocation3 + $0x1], 1 }
 0x29e   :  { %815 = vsyncpa [#allocation6], 1 }
 0x29f   :  { %816 = vsyncpa [#allocation4], 1 }
 0x2a0   :  { %818 = vsyncpa [#allocation4 + $0x1], 1 }
 0x2a1   :  { %819 = vsyncpa [#allocation9], 1 }
 0x2a2   :  { %821 = vsyncpa [#allocation9 + $0x1], 1 }

</bundles_post_ra>
